<compile_context>
chip_gen: v7x
topology: tpu7x:2x2x1
jax: 0.10.0
libtpu: 0.0.40
codegen_flags: <defaults>
</compile_context>

<pallas_src>
import jax
import jax.numpy as jnp
from jax.experimental import pallas as pl
from jax.experimental.pallas import tpu as pltpu

_MAX_TILE_B = 8192               # max batch rows (lanes) per grid step
_MAX_L = 64                      # fixed |Iu| padding -> one compile for |Iu| <= 64
_VMEM_LIMIT = 32 * 1024 * 1024   # explicit scoped-VMEM budget (v7x-safe; ~9 MiB used)


def _round_up(x, m):
    return ((x + m - 1) // m) * m


def _bucket_batch(b):
    """Pad batch to 128 * 2^k: lane-dense vregs + a small set of compile buckets."""
    n128 = max(1, _round_up(b, 128) // 128)
    return 128 * (1 << (n128 - 1).bit_length())


def _svdpp_kernel(impl_ref, uvec_ref, ivec_ref, bias_ref, out_ref):
    """One batch tile; the batch lives on lanes of the (1, tile_b) output.

    impl_ref : VMEM (1, D)       f32   implicit-feedback vector (call-invariant)
    uvec_ref : VMEM (tile_b, D)  bf16  gathered user embeddings (natural layout)
    ivec_ref : VMEM (tile_b, D)  bf16  gathered item embeddings (natural layout)
    bias_ref : VMEM (1, tile_b)  f32   mu + user_bias + item_bias (pre-merged)
    out_ref  : VMEM (1, tile_b)  f32   rating row (lane-dense, unmasked stores)
    """
    user_vec = uvec_ref[...].astype(jnp.float32) + impl_ref[...]      # (tile_b, D)
    prod = (user_vec * ivec_ref[...].astype(jnp.float32)).astype(jnp.bfloat16)
    # Per-row dot over D without transposing `prod`: contract the D axis of a
    # small ones matrix against the D (minor) axis of prod on the MXU.  The
    # result comes out batch-on-lanes: (8, tile_b); row 0 is the batched dot.
    ones = jnp.ones((8, prod.shape[1]), dtype=jnp.bfloat16)
    dots = jax.lax.dot_general(
        ones, prod,
        dimension_numbers=(((1,), (1,)), ((), ())),
        preferred_element_type=jnp.float32)                           # (8, tile_b)
    out_ref[...] = dots[0:1, :] + bias_ref[...]


@jax.jit
def _svdpp_forward_padded(user_emb, item_emb, yj, user_bias, item_bias, mu,
                          uidx, iidx, iu, l_valid):
    """Runs on already-padded index arrays; shapes are static per bucket."""
    b_pad = uidx.shape[0]
    d = user_emb.shape[1]
    l_pad = iu.shape[0]

    # Batch tiling: biggest lane-dense tile <= _MAX_TILE_B, with grid_b >= 2
    # whenever b_pad > 128 so both v7x TensorCores get work ("parallel" axis).
    if b_pad <= 128:
        tile_b = b_pad
    elif b_pad // 2 <= _MAX_TILE_B:
        tile_b = b_pad // 2
    else:
        tile_b = _MAX_TILE_B
    grid_b = b_pad // tile_b

    # --- implicit feedback: batch-tile-invariant, hoisted out of the grid.
    mask = (jnp.arange(l_pad) < l_valid).astype(jnp.float32)[:, None]     # (L_pad, 1)
    impl = jnp.sum(yj[iu].astype(jnp.float32) * mask, axis=0, keepdims=True)
    impl = impl / jnp.sqrt(l_valid.astype(jnp.float32))                   # (1, D) f32

    # --- gathers in natural (B_pad, D) layout: no extra transpose pass in HBM.
    # TODO(synk): the embedding row-gathers stay in XLA; an in-kernel DMA gather
    # is descriptor-bound at D=32 so it is intentionally not done in Pallas.
    uvec = user_emb[uidx]                                                 # (B_pad, D) bf16
    ivec = item_emb[iidx]                                                 # (B_pad, D) bf16
    bias = (user_bias[uidx, 0] + item_bias[iidx, 0] + mu)[None, :]        # (1, B_pad) f32

    rating = pl.pallas_call(
        _svdpp_kernel,
        out_shape=jax.ShapeDtypeStruct((1, b_pad), jnp.float32),
        grid=(grid_b,),
        in_specs=[
            pl.BlockSpec((1, d), lambda i: (0, 0)),          # impl (resident)
            pl.BlockSpec((tile_b, d), lambda i: (i, 0)),     # user vectors
            pl.BlockSpec((tile_b, d), lambda i: (i, 0)),     # item vectors
            pl.BlockSpec((1, tile_b), lambda i: (0, i)),     # merged bias row
        ],
        out_specs=pl.BlockSpec((1, tile_b), lambda i: (0, i)),
        compiler_params=pltpu.CompilerParams(
            dimension_semantics=("parallel",),
            vmem_limit_bytes=_VMEM_LIMIT),
    )(impl, uvec, ivec, bias)

    return rating.reshape(-1)                                             # (B_pad,)


class SVDppPallas:
    """JAX/Pallas re-implementation of the PyTorch SVDpp module."""

    def __init__(self, params, key):
        self.num_users = params["num_users"]
        self.num_items = params["num_items"]
        self.latent_dim = params["latent_dim"]
        self.mu = float(params["global_mean"])

        k1, k2, k3 = jax.random.split(key, 3)
        # torch.nn.Embedding default init: N(0, 1).  Tables stored in bf16 to
        # halve HBM traffic of the (B, D)-proportional gathers/loads; the
        # kernel upcasts to f32 right after load.
        self.user_embedding = jax.random.normal(
            k1, (self.num_users, self.latent_dim), dtype=jnp.float32
        ).astype(jnp.bfloat16)
        self.item_embedding = jax.random.normal(
            k2, (self.num_items, self.latent_dim), dtype=jnp.float32
        ).astype(jnp.bfloat16)
        self.yj = jax.random.normal(
            k3, (self.num_items, self.latent_dim), dtype=jnp.float32
        ).astype(jnp.bfloat16)
        # Biases explicitly zeroed in the reference module; kept f32 (tiny).
        self.user_bias = jnp.zeros((self.num_users, 1), dtype=jnp.float32)
        self.item_bias = jnp.zeros((self.num_items, 1), dtype=jnp.float32)

    def forward(self, user_idx, item_idx, Iu):
        """user_idx, item_idx: int (B,); Iu: list/array of item ids (non-empty)."""
        user_idx = jnp.asarray(user_idx, dtype=jnp.int32)
        item_idx = jnp.asarray(item_idx, dtype=jnp.int32)
        B = int(user_idx.shape[0])

        iu = jnp.asarray(Iu, dtype=jnp.int32).reshape(-1)
        L = int(iu.shape[0])
        if L == 0:
            raise ValueError("Iu must be non-empty (reference divides by sqrt(|Iu|)).")

        # Bucketed padding: one compiled executable per (b_pad, l_pad) bucket.
        b_pad = _bucket_batch(B)
        l_pad = _MAX_L if L <= _MAX_L else _round_up(L, _MAX_L)

        uidx = jnp.pad(user_idx, (0, b_pad - B))    # padded rows gather row 0,
        iidx = jnp.pad(item_idx, (0, b_pad - B))    # sliced off below
        iu_p = jnp.pad(iu, (0, l_pad - L))          # masked inside the jit

        rating = _svdpp_forward_padded(
            self.user_embedding, self.item_embedding, self.yj,
            self.user_bias, self.item_bias, jnp.float32(self.mu),
            uidx, iidx, iu_p, jnp.int32(L))
        return rating[:B]                            # (B,)

    # Pure-JAX reference (same bf16-stored tables, f32 math) for correctness.
    def forward_ref(self, user_idx, item_idx, Iu):
        iu = jnp.asarray(Iu, dtype=jnp.int32)
        L = iu.shape[0]
        uv = self.user_embedding[user_idx].astype(jnp.float32)
        iv = self.item_embedding[item_idx].astype(jnp.float32)
        impl = jnp.sum(self.yj[iu].astype(jnp.float32), axis=0) / jnp.sqrt(
            jnp.float32(L))
        dot = jnp.sum((uv + impl[None, :]) * iv, axis=1)
        return (dot + self.mu + self.user_bias[user_idx, 0]
                + self.item_bias[item_idx, 0])


if __name__ == "__main__":
    params = {
        "num_users": 32,
        "num_items": 64,
        "latent_dim": 32,
        "global_mean": 3.5,
    }
    root = jax.random.PRNGKey(0)
    k_model, k_u, k_i = jax.random.split(root, 3)
    model = SVDppPallas(params, k_model)

    B = 8
    user_idx = jax.random.randint(k_u, (B,), 0, params["num_users"], dtype=jnp.int32)
    item_idx = jax.random.randint(k_i, (B,), 0, params["num_items"], dtype=jnp.int32)
    Iu = [3, 7, 15, 21, 42]  # items the user interacted with before

    rating = model.forward(user_idx, item_idx, Iu)
    rating = jax.block_until_ready(rating)

    ref = model.forward_ref(user_idx, item_idx, Iu)
    assert rating.shape == (B,)
    # bf16-stored tables + bf16 MXU pass => looser tolerance than the pure-f32
    # version (errors here are ~1e-2; real formula bugs are O(1) and still caught).
    assert jnp.allclose(rating, ref, atol=5e-2, rtol=5e-2), (
        float(jnp.max(jnp.abs(rating - ref))))

    print("KERNEL_OK")
</pallas_src>

<mosaic_0001>
module attributes {stable_mosaic.version = 11 : i64} {
  func.func @_svdpp_kernel(%arg0: i32, %arg1: memref<1x32xf32, #tpu.memory_space<vmem>>, %arg2: memref<128x32xbf16, #tpu.memory_space<vmem>>, %arg3: memref<128x32xbf16, #tpu.memory_space<vmem>>, %arg4: memref<1x128xf32, #tpu.memory_space<vmem>>, %arg5: memref<1x128xf32, #tpu.memory_space<vmem>>) attributes {dimension_semantics = [#tpu.dimension_semantics<parallel>], iteration_bounds = array<i64: 1>, scalar_prefetch = 0 : i64, scratch_operands = 0 : i64, tpu.core_type = #tpu.core_type<tc>, window_params = [{pipeline_mode = #tpu.pipeline_mode<synchronous>, transform_indices = @transform_0, window_bounds = array<i64: 1, 32>}, {transform_indices = @transform_1, window_bounds = array<i64: 128, 32>}, {transform_indices = @transform_2, window_bounds = array<i64: 128, 32>}, {transform_indices = @transform_3, window_bounds = array<i64: 1, 128>}, {transform_indices = @transform_4, window_bounds = array<i64: 1, 128>}]} {
    %c0 = arith.constant 0 : index
    %c0_0 = arith.constant 0 : index
    %0 = vector.load %arg2[%c0, %c0_0] : memref<128x32xbf16, #tpu.memory_space<vmem>>, vector<128x32xbf16>
    %1 = arith.extf %0 : vector<128x32xbf16> to vector<128x32xf32>
    %c0_1 = arith.constant 0 : index
    %c0_2 = arith.constant 0 : index
    %2 = vector.load %arg1[%c0_1, %c0_2] : memref<1x32xf32, #tpu.memory_space<vmem>>, vector<1x32xf32>
    %3 = vector.broadcast %2 : vector<1x32xf32> to vector<128x32xf32>
    %4 = arith.addf %1, %3 : vector<128x32xf32>
    %c0_3 = arith.constant 0 : index
    %c0_4 = arith.constant 0 : index
    %5 = vector.load %arg3[%c0_3, %c0_4] : memref<128x32xbf16, #tpu.memory_space<vmem>>, vector<128x32xbf16>
    %6 = arith.extf %5 : vector<128x32xbf16> to vector<128x32xf32>
    %7 = arith.mulf %4, %6 : vector<128x32xf32>
    %8 = arith.truncf %7 : vector<128x32xf32> to vector<128x32xbf16>
    %cst = arith.constant 1.000000e+00 : bf16
    %9 = vector.broadcast %cst : bf16 to vector<8x32xbf16>
    %cst_5 = arith.constant dense<0.000000e+00> : vector<8x128xf32>
    %10 = tpu.matmul %9, %8, %cst_5 {dimension_numbers = #tpu.dot_dimension_numbers<[1], [1], [0], [0], [0, 0, 1, 0], [], []>} : vector<8x32xbf16>, vector<128x32xbf16>, vector<8x128xf32> -> vector<8x128xf32>
    %11 = vector.extract_strided_slice %10 {offsets = [0, 0], sizes = [1, 128], strides = [1, 1]} : vector<8x128xf32> to vector<1x128xf32>
    %c0_6 = arith.constant 0 : index
    %c0_7 = arith.constant 0 : index
    %12 = vector.load %arg4[%c0_6, %c0_7] : memref<1x128xf32, #tpu.memory_space<vmem>>, vector<1x128xf32>
    %13 = arith.addf %11, %12 : vector<1x128xf32>
    %c0_8 = arith.constant 0 : index
    %c0_9 = arith.constant 0 : index
    %14 = vector.load %arg5[%c0_8, %c0_9] : memref<1x128xf32, #tpu.memory_space<vmem>>, vector<1x128xf32>
    tpu.vector_store %arg5[%c0_8, %c0_9], %13 {strides = array<i32>} : memref<1x128xf32, #tpu.memory_space<vmem>>, vector<1x128xf32>,
    return
  }
  func.func @transform_0(%arg0: i32) -> (i32, i32) {
    %c0_i32 = arith.constant 0 : i32
    %c0_i32_0 = arith.constant 0 : i32
    %c0_i32_1 = arith.constant 0 : i32
    return %c0_i32, %c0_i32_0 : i32, i32
  }
  func.func @transform_1(%arg0: i32) -> (i32, i32) {
    %c0_i32 = arith.constant 0 : i32
    %c0_i32_0 = arith.constant 0 : i32
    return %arg0, %c0_i32 : i32, i32
  }
  func.func @transform_2(%arg0: i32) -> (i32, i32) {
    %c0_i32 = arith.constant 0 : i32
    %c0_i32_0 = arith.constant 0 : i32
    return %arg0, %c0_i32 : i32, i32
  }
  func.func @transform_3(%arg0: i32) -> (i32, i32) {
    %c0_i32 = arith.constant 0 : i32
    %c0_i32_0 = arith.constant 0 : i32
    return %c0_i32, %arg0 : i32, i32
  }
  func.func @transform_4(%arg0: i32) -> (i32, i32) {
    %c0_i32 = arith.constant 0 : i32
    %c0_i32_0 = arith.constant 0 : i32
    return %c0_i32, %arg0 : i32, i32
  }
}

</mosaic_0001>

<bundles_post_ra>
// kernel: _svdpp_forward_padded.1
= control target key start
LH: loop header
LB: loop body
LE: loop exit
PB: predicated region body
PF: predicated region fallthrough
CT: control target
= control target key end

     0   :  { %v353_v3 = vmov 0.0   ;;  %s484_s0 = inlined_call_operand.vmem [shape: f32[1,32], index: 0, kind: input, shape index: {}]   ;;  %s485_s1 = inlined_call_operand.vmem [shape: bf16[128,32], index: 1, kind: input, shape index: {}]   ;;  %s486_s2 = inlined_call_operand.vmem [shape: bf16[128,32], index: 2, kind: input, shape index: {}]   ;;  %s487_s3 = inlined_call_operand.vmem [shape: f32[1,128], index: 3, kind: input, shape index: {}]   ;;  %s488_s4 = inlined_call_operand.hbm [shape: f32[1,128], index: 4, kind: output, shape index: {}]  }
   0x1   :  { %v219_v0 = vld [vmem:[%s485_s1] sm:$0xff]   ;;  %305 = vmatprep.subr.bf16.mxu0 %v353_v3  ;;  %v282_v8 = vld [vmem:[%s485_s1 + $0x8] sm:$0xff]   ;;  %v283_v16 = vld [vmem:[%s485_s1 + $0x10] sm:$0xff]  }
   0x2   :  { %v388_v1 = vld [vmem:[%s484_s0] ss:$0 sm:$0xff]  ;;  %v220_v4 = vunpack.c.l.bf16 %v219_v0  ;;  %v221_v5 = vunpack.c.h.bf16 %v219_v0  ;;  %v289_v9 = vld [vmem:[%s486_s2 + $0x8] sm:$0xff]   ;;  %v224_v10 = vunpack.c.l.bf16 %v282_v8  ;;  %v225_v11 = vunpack.c.h.bf16 %v282_v8 }
   0x3   :  { %v251_v2 = vld [vmem:[%s486_s2] sm:$0xff]   ;;  %v256_v14 = vunpack.c.l.bf16 %v289_v9  ;;  %v257_v15 = vunpack.c.h.bf16 %v289_v9 }
   0x4   :  { %v252_v6 = vunpack.c.l.bf16 %v251_v2  ;;  %v253_v7 = vunpack.c.h.bf16 %v251_v2  ;;  %v59_v12 = vadd.f32 %v220_v4, %v388_v1  ;;  %v60_v13 = vadd.f32 %v221_v5, %v388_v1 }
   0x5   :  { %v61_v17 = vadd.f32 %v224_v10, %v388_v1  ;;  %v62_v18 = vadd.f32 %v225_v11, %v388_v1 }
   0x6   :  { %v107_v19 = vmul.f32 %v252_v6, %v59_v12  ;;  %v108_v20 = vmul.f32 %v253_v7, %v60_v13 }
   0x7   :  { %9 = vsyncpa [#allocation3], 0  ;;  %vm131_vm0 = vcmask 261120   ;;  %v228_v21 = vunpack.c.l.bf16 %v283_v16  ;;  %v109_v23 = vmul.f32 %v256_v14, %v61_v17  ;;  %v110_v24 = vmul.f32 %v257_v15, %v62_v18  ;;  %v290_v26 = vld [vmem:[%s486_s2 + $0x10] sm:$0xff]   ;;  %v284_v33 = vld [vmem:[%s485_s1 + $0x18] sm:$0xff]   ;;  %s356_s22 = smov [#allocation2]  }
   0x8   :  { %v123_v22 = vpack.c.bf16 %v108_v20, %v107_v19  ;;  %v229_v25 = vunpack.c.h.bf16 %v283_v16  ;;  %v260_v28 = vunpack.c.l.bf16 %v290_v26  ;;  %v261_v32 = vunpack.c.h.bf16 %v290_v26  ;;  %v291_v39 = vld [vmem:[%s486_s2 + $0x18] sm:$0xff]   ;;  %v285_v45 = vld [vmem:[%s485_s1 + $0x20] sm:$0xff]   ;;  %v286_v57 = vld [vmem:[%s485_s1 + $0x28] sm:$0xff]   ;;  %s208_s23 = sshll.u32 %s356_s22, 4  ;;  %s209_s23 = int_to_ptr.vmem [resolvable:$true] %s208_s23 }
   0x9   :  { %v124_v29 = vpack.c.bf16 %v110_v24, %v109_v23  ;;  %v63_v30 = vadd.f32 %v228_v21, %v388_v1  ;;  %v232_v34 = vunpack.c.l.bf16 %v284_v33  ;;  %v233_v38 = vunpack.c.h.bf16 %v284_v33  ;;  %v292_v51 = vld [vmem:[%s486_s2 + $0x20] sm:$0xff]   ;;  %v293_v63 = vld [vmem:[%s486_s2 + $0x28] sm:$0xff]   ;;  %v287_v7 = vld [vmem:[%s485_s1 + $0x30] sm:$0xff]   ;;  %s329_s24 = scalar_lea.vmem %s209_s23, 16  ;;  %s333_s0 = scalar_lea.vmem %s209_s23, 32 }
   0xa   :  { %v136_v27 = vsel %vm131_vm0, %v123_v22, 0  ;;  %v64_v31 = vadd.f32 %v229_v25, %v388_v1  ;;  %v264_v41 = vunpack.c.l.bf16 %v291_v39  ;;  %v265_v44 = vunpack.c.h.bf16 %v291_v39  ;;  %v294_v13 = vld [vmem:[%s486_s2 + $0x30] sm:$0xff]   ;;  %v288_v19 = vld [vmem:[%s485_s1 + $0x38] sm:$0xff]   ;;  %p330_p0 = scmp.ne.s32.totalorder %s209_s23, %s329_s24  ;;  %p334_p1 = scmp.lt.s32.totalorder %s209_s23, %s209_s23 }
   0xb   :  { %306 = vmatpush3.bf16.xpose.msra.mxu0 %v136_v27  ;;  %v139_v35 = vsel %vm131_vm0, %v124_v29, 0  ;;  %v111_v36 = vmul.f32 %v260_v28, %v63_v30  ;;  %v65_v40 = vadd.f32 %v232_v34, %v388_v1  ;;  %v66_v43 = vadd.f32 %v233_v38, %v388_v1  ;;  %v295_v25 = vld [vmem:[%s486_s2 + $0x38] sm:$0xff]   ;;  %p335_p2 = scmp.lt.s32.totalorder %s333_s0, %s329_s24 }
   0xc   :  { %307 = vmatprep.subr.bf16.mxu0 %v353_v3  ;;  %v112_v37 = vmul.f32 %v261_v32, %v64_v31  ;;  %vm354_vm1 = vmmov 0   ;;  %v236_v46 = vunpack.c.l.bf16 %v285_v45  ;;  %v237_v50 = vunpack.c.h.bf16 %v285_v45 }
   0xd   :  { %321 = vmatprep.mubr.msk.bf16.mxu0 %vm354_vm1, %v353_v3  ;;  %v113_v48 = vmul.f32 %v264_v41, %v65_v40  ;;  %v114_v49 = vmul.f32 %v265_v44, %v66_v43  ;;  %v268_v52 = vunpack.c.l.bf16 %v292_v51  ;;  %v269_v56 = vunpack.c.h.bf16 %v292_v51  ;;  %p336_p3 = por %p335_p2, %p334_p1 }
   0xe   :  { %v125_v42 = vpack.c.bf16 %v112_v37, %v111_v36  ;;  %v67_v54 = vadd.f32 %v236_v46, %v388_v1  ;;  %v68_v55 = vadd.f32 %v237_v50, %v388_v1  ;;  %v240_v58 = vunpack.c.l.bf16 %v286_v57  ;;  %v199_v37 = vld [vmem:[%s487_s3] sm:$0x1] }
   0xf   :  { %v126_v53 = vpack.c.bf16 %v114_v49, %v113_v48  ;;  %v241_v62 = vunpack.c.h.bf16 %v286_v57  ;;  %v272_v0 = vunpack.c.l.bf16 %v293_v63  ;;  %v273_v6 = vunpack.c.h.bf16 %v293_v63  ;;  %p337_p4 = pnand %p336_p3, %p330_p0 }
  0x10   :  { %v142_v47 = vsel %vm131_vm0, %v125_v42, 0  ;;  %v115_v60 = vmul.f32 %v268_v52, %v67_v54  ;;  %v116_v61 = vmul.f32 %v269_v56, %v68_v55  ;;  %v69_v4 = vadd.f32 %v240_v58, %v388_v1 }
  0x11   :  { %v145_v59 = vsel %vm131_vm0, %v126_v53, 0  ;;  %v70_v5 = vadd.f32 %v241_v62, %v388_v1  ;;  %v244_v8 = vunpack.c.l.bf16 %v287_v7  ;;  %v245_v12 = vunpack.c.h.bf16 %v287_v7 }
  0x12   :  { %v127_v2 = vpack.c.bf16 %v116_v61, %v115_v60  ;;  %v117_v10 = vmul.f32 %v272_v0, %v69_v4  ;;  %v276_v17 = vunpack.c.l.bf16 %v294_v13  ;;  %v277_v18 = vunpack.c.h.bf16 %v294_v13 }
  0x13   :  { %308 = vmatpush3.bf16.xpose.msra.mxu0 %v139_v35  ;;  %v118_v11 = vmul.f32 %v273_v6, %v70_v5  ;;  %v71_v14 = vadd.f32 %v244_v8, %v388_v1  ;;  %v72_v16 = vadd.f32 %v245_v12, %v388_v1  ;;  %v248_v20 = vunpack.c.l.bf16 %v288_v19 }
  0x14   :  { %309 = vmatprep.subr.bf16.mxu0 %v353_v3  ;;  %v148_v9 = vsel %vm131_vm0, %v127_v2, 0  ;;  %v249_v24 = vunpack.c.h.bf16 %v288_v19  ;;  %v280_v26 = vunpack.c.l.bf16 %v295_v25  ;;  %v281_v30 = vunpack.c.h.bf16 %v295_v25 }
  0x15   :  { %v128_v15 = vpack.c.bf16 %v118_v11, %v117_v10  ;;  %v119_v22 = vmul.f32 %v276_v17, %v71_v14  ;;  %v120_v23 = vmul.f32 %v277_v18, %v72_v16  ;;  %v73_v28 = vadd.f32 %v248_v20, %v388_v1 }
  0x16   :  { %v74_v29 = vadd.f32 %v249_v24, %v388_v1  ;;  %v355_v36 = vmov 1065369472  }
  0x17   :  { %v151_v21 = vsel %vm131_vm0, %v128_v15, 0  ;;  %v129_v27 = vpack.c.bf16 %v120_v23, %v119_v22  ;;  %v121_v32 = vmul.f32 %v280_v26, %v73_v28 }
  0x18   :  { %v122_v33 = vmul.f32 %v281_v30, %v74_v29 }
  0x19   :  { %v154_v31 = vsel %vm131_vm0, %v129_v27, 0 }
  0x1a   :  { %v130_v34 = vpack.c.bf16 %v122_v33, %v121_v32 }
  0x1b   :  { %310 = vmatpush3.bf16.xpose.msra.mxu0 %v142_v47 }
  0x1c   :  { %311 = vmatprep.subr.bf16.mxu0 %v353_v3  ;;  %v157_v35 = vsel %vm131_vm0, %v130_v34, 0 }
  0x23   :  { %312 = vmatpush3.bf16.xpose.msra.mxu0 %v145_v59 }
  0x24   :  { %313 = vmatprep.subr.bf16.mxu0 %v353_v3 }
  0x2b   :  { %314 = vmatpush3.bf16.xpose.msra.mxu0 %v148_v9 }
  0x2c   :  { %315 = vmatprep.subr.bf16.mxu0 %v353_v3 }
  0x33   :  { %316 = vmatpush3.bf16.xpose.msra.mxu0 %v151_v21 }
  0x34   :  { %317 = vmatprep.subr.bf16.mxu0 %v353_v3 }
  0x3b   :  { %318 = vmatpush3.bf16.xpose.msra.mxu0 %v154_v31 }
  0x3c   :  { %319 = vmatprep.subr.bf16.mxu0 %v353_v3 }
  0x43   :  { %320 = vmatpush3.bf16.xpose.msra.mxu0 %v157_v35 }
  0x4a   :  { %322 = vmatmul.mubr.msk.bf16.vlgmr.msra.gmra.mrb[0].mxu0 %vm131_vm0, %v355_v36 }
 0x11d   :  { %v193_v1 = vpop.f32.mrb[0].mxu0 }
 0x11e   :  { %v200_v38 = vadd.f32 %v199_v37, %v193_v1  ;;  %v323_v39 = vpop.f32.mrb[1].mxu0 }
 0x11f   :  { %v196_v40 = vpop.f32.mrb[2].mxu0 }
 0x120   :  { %201 = vst [vmem:[#allocation2] sm:$0x1] %v200_v38  ;;  %v324_v3 = vpop.f32.mrb[3].mxu0 }
 0x121   :  { %340 = shalt.err (!%p337_p4)
}
 0x122   :  { %s341_s3 = scalar_lea.hbm %s488_s4, 16 }
 0x123   :  { %p342_p5 = scmp.ne.s32.totalorder %s488_s4, %s341_s3  ;;  %p345_p6 = scmp.lt.u32.totalorder %s341_s3, %s488_s4 }
 0x125   :  { %p347_p7 = pnand %p345_p6, %p342_p5 }
 0x127   :  { %350 = shalt.err (!%p347_p7)
}
 0x128   :  { %211 = dma.vmem_to_hbm [thread:$0]  %s209_s23, 16, %s488_s4, [#allocation3]  }
 0x129   :  { %351 = dma.done.wait [#allocation3], 16  }
 0x12a   :  { %352 = vsyncadd [#allocation3], 4294967280 }
 0x12b   :  { %215 = vsyncpa [#allocation3], 1 }

</bundles_post_ra>
